<compile_context>
chip_gen: v7x
topology: tpu7x:2x2x1
jax: 0.10.0
libtpu: 0.0.40
codegen_flags: <defaults>
</compile_context>

<pallas_src>
import jax
import jax.numpy as jnp
from jax.experimental import pallas as pl
from jax.experimental.pallas import tpu as pltpu


def se_block_kernel(x_ref, w1t_ref, w2_ref, o_ref):
    # x_ref  : (bn, C, HW)  block of samples; channels on sublanes, flattened
    #                       spatial on the 128-lane axis (lane-dense stores).
    # w1t_ref: (C, Ch)      transpose of nn.Linear(c, c//r).weight
    # w2_ref : (C, Ch)      nn.Linear(c//r, c).weight (already (c, c//r))
    # o_ref  : (bn, C, HW)
    x = x_ref[...].astype(jnp.float32)                       # (bn, C, HW)
    inv_hw = 1.0 / x.shape[-1]

    # ---- squeeze: per-(sample, channel) spatial mean (lane reduction, XLU) ----
    mean = jnp.sum(x, axis=2, keepdims=True) * inv_hw        # (bn, C, 1)

    # ---- excitation layer 1: h = relu(W1 @ mean) as VPU broadcast-FMA ----
    # (1, C, Ch) * (bn, C, 1) -> (bn, C, Ch), reduce over channels (sublanes).
    w1t = w1t_ref[...].astype(jnp.float32)[None, :, :]       # (1, C, Ch)
    h = jnp.sum(w1t * mean, axis=1, keepdims=True)           # (bn, 1, Ch)
    h = jnp.maximum(h, 0.0)

    # ---- excitation layer 2: s = W2 @ h as VPU broadcast-FMA ----
    # (1, C, Ch) * (bn, 1, Ch) -> (bn, C, Ch), reduce over hidden (lanes).
    w2 = w2_ref[...].astype(jnp.float32)[None, :, :]         # (1, C, Ch)
    s = jnp.sum(w2 * h, axis=2, keepdims=True)               # (bn, C, 1)

    # ---- sigmoid (EUP) + channel-wise rescale of the input ----
    scale = jax.nn.sigmoid(s)                                 # (bn, C, 1)
    o_ref[...] = (x * scale).astype(o_ref.dtype)              # broadcast over lanes


def se_block_forward(x_nchw, w1, w2, *, vmem_budget_bytes=8 * 1024 * 1024):
    """SE_Block forward. x_nchw: (N, C, H, W); w1: (C//r, C); w2: (C, C//r)."""
    n, c, h, w = x_nchw.shape
    hw = h * w
    ch = w1.shape[0]  # c // r

    # Free contiguous reshape (no HBM round-trip); tiny weight transpose only.
    x = x_nchw.reshape(n, c, hw)
    w1t = jnp.transpose(w1, (1, 0))                          # (C, Ch)

    # Samples per grid step: as many as comfortably fit a VMEM budget
    # (x block + out block, double-buffered => ~4 live copies), forced to
    # divide N so every block is full (no partial blocks on the batch dim).
    bytes_per_sample = c * hw * x_nchw.dtype.itemsize
    bn = max(1, min(n, vmem_budget_bytes // (4 * max(1, bytes_per_sample))))
    while n % bn:
        bn -= 1

    out = pl.pallas_call(
        se_block_kernel,
        out_shape=jax.ShapeDtypeStruct((n, c, hw), x_nchw.dtype),
        grid_spec=pltpu.PrefetchScalarGridSpec(
            num_scalar_prefetch=0,
            grid=(n // bn,),
            in_specs=[
                pl.BlockSpec((bn, c, hw), lambda i: (i, 0, 0)),  # sample block
                pl.BlockSpec((c, ch), lambda i: (0, 0)),         # small weights,
                pl.BlockSpec((c, ch), lambda i: (0, 0)),         # fetched once
            ],
            out_specs=pl.BlockSpec((bn, c, hw), lambda i: (i, 0, 0)),
        ),
        compiler_params=pltpu.CompilerParams(
            dimension_semantics=("parallel",),   # shard sample blocks across TCs
        ),
    )(x, w1t, w2)

    return out.reshape(n, c, h, w)


def se_block_reference(x, w1, w2):
    """Pure-JAX reference mirroring the PyTorch SE_Block."""
    y = jnp.mean(x, axis=(2, 3))                             # (N, C)
    y = jnp.maximum(y @ w1.T, 0.0)                           # (N, C//r)
    y = jax.nn.sigmoid(y @ w2.T)                             # (N, C)
    return x * y[:, :, None, None]


if __name__ == "__main__":
    # SE_Block(c=16, r=4): Linear(16 -> 4, no bias), ReLU, Linear(4 -> 16, no bias), Sigmoid
    n, c, r, h, w = 2, 16, 4, 16, 16
    ch = c // r

    key = jax.random.PRNGKey(0)
    kx, k1, k2 = jax.random.split(key, 3)
    x = jax.random.normal(kx, (n, c, h, w), jnp.float32)
    w1 = 0.3 * jax.random.normal(k1, (ch, c), jnp.float32)   # nn.Linear(c, c//r).weight
    w2 = 0.3 * jax.random.normal(k2, (c, ch), jnp.float32)   # nn.Linear(c//r, c).weight

    out = se_block_forward(x, w1, w2)
    out = jax.block_until_ready(out)

    ref = se_block_reference(x, w1, w2)
    assert out.shape == (n, c, h, w)
    assert jnp.allclose(out, ref, rtol=1e-5, atol=1e-5)

    print("KERNEL_OK")
</pallas_src>

<mosaic_0001>
module attributes {stable_mosaic.version = 11 : i64} {
  func.func @se_block_kernel(%arg0: i32, %arg1: memref<2x16x256xf32, #tpu.memory_space<vmem>>, %arg2: memref<16x4xf32, #tpu.memory_space<vmem>>, %arg3: memref<16x4xf32, #tpu.memory_space<vmem>>, %arg4: memref<2x16x256xf32, #tpu.memory_space<vmem>>) attributes {dimension_semantics = [#tpu.dimension_semantics<parallel>], iteration_bounds = array<i64: 1>, scalar_prefetch = 0 : i64, scratch_operands = 0 : i64, tpu.core_type = #tpu.core_type<tc>, window_params = [{transform_indices = @transform_0, window_bounds = array<i64: 2, 16, 256>}, {pipeline_mode = #tpu.pipeline_mode<synchronous>, transform_indices = @transform_1, window_bounds = array<i64: 16, 4>}, {pipeline_mode = #tpu.pipeline_mode<synchronous>, transform_indices = @transform_2, window_bounds = array<i64: 16, 4>}, {transform_indices = @transform_3, window_bounds = array<i64: 2, 16, 256>}]} {
    %c0 = arith.constant 0 : index
    %c0_0 = arith.constant 0 : index
    %c0_1 = arith.constant 0 : index
    %0 = vector.load %arg1[%c0, %c0_0, %c0_1] : memref<2x16x256xf32, #tpu.memory_space<vmem>>, vector<2x16x256xf32>
    %cst = arith.constant dense<0.000000e+00> : vector<2x16xf32>
    %1 = vector.multi_reduction <add>, %0, %cst [2] : vector<2x16x256xf32> to vector<2x16xf32>
    %2 = vector.shape_cast %1 : vector<2x16xf32> to vector<2x16x1xf32>
    %cst_2 = arith.constant 3.906250e-03 : f32
    %3 = vector.broadcast %cst_2 : f32 to vector<2x16x1xf32>
    %4 = arith.mulf %2, %3 : vector<2x16x1xf32>
    %c0_3 = arith.constant 0 : index
    %c0_4 = arith.constant 0 : index
    %5 = vector.load %arg2[%c0_3, %c0_4] : memref<16x4xf32, #tpu.memory_space<vmem>>, vector<16x4xf32>
    %6 = vector.shape_cast %5 : vector<16x4xf32> to vector<1x16x4xf32>
    %7 = vector.broadcast %6 : vector<1x16x4xf32> to vector<2x16x4xf32>
    %8 = vector.broadcast %4 : vector<2x16x1xf32> to vector<2x16x4xf32>
    %9 = arith.mulf %7, %8 : vector<2x16x4xf32>
    %cst_5 = arith.constant dense<0.000000e+00> : vector<2x4xf32>
    %10 = vector.multi_reduction <add>, %9, %cst_5 [1] : vector<2x16x4xf32> to vector<2x4xf32>
    %11 = vector.shape_cast %10 : vector<2x4xf32> to vector<2x1x4xf32>
    %cst_6 = arith.constant 0.000000e+00 : f32
    %12 = vector.broadcast %cst_6 : f32 to vector<2x1x4xf32>
    %13 = arith.maximumf %11, %12 : vector<2x1x4xf32>
    %c0_7 = arith.constant 0 : index
    %c0_8 = arith.constant 0 : index
    %14 = vector.load %arg3[%c0_7, %c0_8] : memref<16x4xf32, #tpu.memory_space<vmem>>, vector<16x4xf32>
    %15 = vector.shape_cast %14 : vector<16x4xf32> to vector<1x16x4xf32>
    %16 = vector.broadcast %15 : vector<1x16x4xf32> to vector<2x16x4xf32>
    %17 = vector.broadcast %13 : vector<2x1x4xf32> to vector<2x16x4xf32>
    %18 = arith.mulf %16, %17 : vector<2x16x4xf32>
    %cst_9 = arith.constant dense<0.000000e+00> : vector<2x16xf32>
    %19 = vector.multi_reduction <add>, %18, %cst_9 [2] : vector<2x16x4xf32> to vector<2x16xf32>
    %20 = vector.shape_cast %19 : vector<2x16xf32> to vector<2x16x1xf32>
    %21 = arith.negf %20 : vector<2x16x1xf32>
    %22 = math.exp %21 : vector<2x16x1xf32>
    %cst_10 = arith.constant 1.000000e+00 : f32
    %23 = vector.broadcast %cst_10 : f32 to vector<2x16x1xf32>
    %24 = arith.addf %23, %22 : vector<2x16x1xf32>
    %25 = arith.divf %23, %24 : vector<2x16x1xf32>
    %26 = vector.broadcast %25 : vector<2x16x1xf32> to vector<2x16x256xf32>
    %27 = arith.mulf %0, %26 : vector<2x16x256xf32>
    %c0_11 = arith.constant 0 : index
    %c0_12 = arith.constant 0 : index
    %c0_13 = arith.constant 0 : index
    %28 = vector.load %arg4[%c0_11, %c0_12, %c0_13] : memref<2x16x256xf32, #tpu.memory_space<vmem>>, vector<2x16x256xf32>
    tpu.vector_store %arg4[%c0_11, %c0_12, %c0_13], %27 {strides = array<i32>} : memref<2x16x256xf32, #tpu.memory_space<vmem>>, vector<2x16x256xf32>,
    return
  }
  func.func @transform_0(%arg0: i32) -> (i32, i32, i32) {
    %c0_i32 = arith.constant 0 : i32
    %c0_i32_0 = arith.constant 0 : i32
    %c0_i32_1 = arith.constant 0 : i32
    return %arg0, %c0_i32, %c0_i32_0 : i32, i32, i32
  }
  func.func @transform_1(%arg0: i32) -> (i32, i32) {
    %c0_i32 = arith.constant 0 : i32
    %c0_i32_0 = arith.constant 0 : i32
    %c0_i32_1 = arith.constant 0 : i32
    return %c0_i32, %c0_i32_0 : i32, i32
  }
  func.func @transform_2(%arg0: i32) -> (i32, i32) {
    %c0_i32 = arith.constant 0 : i32
    %c0_i32_0 = arith.constant 0 : i32
    %c0_i32_1 = arith.constant 0 : i32
    return %c0_i32, %c0_i32_0 : i32, i32
  }
  func.func @transform_3(%arg0: i32) -> (i32, i32, i32) {
    %c0_i32 = arith.constant 0 : i32
    %c0_i32_0 = arith.constant 0 : i32
    %c0_i32_1 = arith.constant 0 : i32
    return %arg0, %c0_i32, %c0_i32_0 : i32, i32, i32
  }
}

</mosaic_0001>

<bundles_post_ra>
// kernel: tpu_custom_call.1
= control target key start
LH: loop header
LB: loop body
LE: loop exit
PB: predicated region body
PF: predicated region fallthrough
CT: control target
= control target key end

     0   :  { %8 = vsyncpa [#allocation3], 0  ;;  %s333_s0 = inlined_call_operand.hbm [shape: f32[2,16,256], index: 0, kind: input, shape index: {}]   ;;  %s334_s1 = inlined_call_operand.vmem [shape: f32[16,4], index: 1, kind: input, shape index: {}]   ;;  %s335_s2 = inlined_call_operand.vmem [shape: f32[16,4], index: 2, kind: input, shape index: {}]   ;;  %s336_s3 = inlined_call_operand.hbm [shape: f32[2,16,256], index: 3, kind: output, shape index: {}]  }
   0x1   :  { %9 = vsyncpa [#allocation4], 0  ;;  %s227_s12 = smov [#allocation2]   ;;  %s179_s16 = scalar_lea.hbm %s333_s0, 1024 }
   0x2   :  { %s15_s13 = sshll.u32 %s227_s12, 4  ;;  %p180_p0 = scmp.ne.s32.totalorder %s333_s0, %s179_s16  ;;  %s16_s13 = int_to_ptr.vmem [resolvable:$true] %s15_s13 }
   0x3   :  { %p183_p1 = scmp.lt.u32.totalorder %s179_s16, %s333_s0 }
   0x5   :  { %p185_p2 = pnand %p183_p1, %p180_p0 }
   0x7   :  { %188 = shalt.err (!%p185_p2)
}
   0x8   :  { %s189_s21 = scalar_lea.vmem %s16_s13, 1024  ;;  %p194_p4 = scmp.lt.s32.totalorder %s16_s13, %s16_s13 }
   0x9   :  { %p190_p3 = scmp.ne.s32.totalorder %s16_s13, %s189_s21  ;;  %p195_p5 = scmp.lt.s32.totalorder %s189_s21, %s189_s21 }
   0xb   :  { %p196_p6 = por %p195_p5, %p194_p4 }
   0xd   :  { %p197_p7 = pnand %p196_p6, %p190_p3 }
   0xf   :  { %200 = shalt.err (!%p197_p7)
}
  0x10   :  { %s228_s22 = smov 256   ;;  %s229_s23 = smov 16  }
  0x11   :  { %21 = dma.hbm_to_vmem [thread:$0]  %s333_s0, 1024, %s16_s13, [#allocation3], %s228_s22, %s228_s22, %s229_s23  }
  0x12   :  { %223 = dma.done.wait [#allocation3], 1024  }
  0x13   :  { %224 = vsyncadd [#allocation3], 4294966272  ;;  %v266_v0 = vld [vmem:[#allocation2 + $0x20] sm:$0xff]  ;;  %v268_v1 = vld [vmem:[#allocation2 + $0x28] sm:$0xff]  ;;  %vm59_vm0 = vcmask 31744  }
  0x14   :  { %v270_v2 = vld [vmem:[#allocation2] sm:$0xff]  ;;  %v43_v3 = vadd.f32 %v268_v1, %v266_v0  ;;  %v274_v4 = vld [vmem:[#allocation2 + $0x8] sm:$0xff]  ;;  %v276_v5 = vld [vmem:[#allocation2 + $0x30] sm:$0xff] }
  0x15   :  { %v278_v6 = vld [vmem:[#allocation2 + $0x38] sm:$0xff]  ;;  %v37_v7 = vadd.f32 %v274_v4, %v270_v2  ;;  %v282_v8 = vld [vmem:[#allocation2 + $0x10] sm:$0xff]  ;;  %v53_v15 = vld [vmem:[%s334_s1] sm:$0xff] }
  0x16   :  { %v284_v9 = vld [vmem:[#allocation2 + $0x18] sm:$0xff]  ;;  %44 = vadd.xlane.f32.xlu1 %v43_v3  ;;  %v46_v10 = vadd.f32 %v278_v6, %v276_v5  ;;  %v54_v18 = vld [vmem:[%s334_s1 + $0x8] sm:$0xff]  ;;  %v80_v45 = vld [vmem:[%s335_s2] sm:$0xff] }
  0x17   :  { %38 = vadd.xlane.f32.xlu0 %v37_v7  ;;  %v40_v11 = vadd.f32 %v284_v9, %v282_v8  ;;  %v81_v44 = vld [vmem:[%s335_s2 + $0x8] sm:$0xff]  ;;  %s230_s2 = smov [#allocation5]  }
  0x18   :  { %s143_s5 = sshll.u32 %s230_s2, 4  ;;  %s144_s5 = int_to_ptr.vmem [resolvable:$true] %s143_s5 }
  0x19   :  { %s201_s6 = scalar_lea.vmem %s144_s5, 1024  ;;  %p206_p9 = scmp.lt.s32.totalorder %s144_s5, %s144_s5 }
  0x1a   :  { %47 = vadd.xlane.f32.xlu1 %v46_v10  ;;  %p202_p8 = scmp.ne.s32.totalorder %s144_s5, %s201_s6  ;;  %p207_p10 = scmp.lt.s32.totalorder %s201_s6, %s201_s6 }
  0x1b   :  { %41 = vadd.xlane.f32.xlu0 %v40_v11 }
  0x1c   :  { %p208_p11 = por %p207_p10, %p206_p9 }
  0x1e   :  { %p209_p12 = pnand %p208_p11, %p202_p8 }
  0xa3   :  { %v45_v12 = vpop.xlane.xlu1 %44 }
  0xa4   :  { %v51_v13 = vmul.f32 0.00390625, %v45_v12  ;;  %v39_v14 = vpop.xlane.xlu0 %38 }
  0xa5   :  { %v49_v16 = vmul.f32 0.00390625, %v39_v14 }
  0xa6   :  { %v57_v17 = vmul.f32 %v53_v15, %v51_v13 }
  0xa7   :  { %v48_v19 = vpop.xlane.xlu1 %47  ;;  %v55_v22 = vmul.f32 %v53_v15, %v49_v16 }
  0xa8   :  { %v52_v20 = vmul.f32 0.00390625, %v48_v19  ;;  %v42_v21 = vpop.xlane.xlu0 %41  ;;  %v69_v24 = vsel %vm59_vm0, %v57_v17, 0.0 }
  0xa9   :  { %v50_v23 = vmul.f32 0.00390625, %v42_v21  ;;  %v60_v28 = vsel %vm59_vm0, %v55_v22, 0.0 }
  0xaa   :  { %v58_v25 = vmul.f32 %v54_v18, %v52_v20 }
  0xab   :  { %v56_v26 = vmul.f32 %v54_v18, %v50_v23 }
  0xac   :  { %v70_v27 = vsel %vm59_vm0, %v58_v25, 0.0 }
  0xad   :  { %v71_v29 = vadd.f32 %v70_v27, %v69_v24  ;;  %v61_v30 = vsel %vm59_vm0, %v56_v26, 0.0 }
  0xae   :  { %v62_v31 = vadd.f32 %v61_v30, %v60_v28 }
  0xaf   :  { %v72_v32 = vrot.slane %v71_v29, 4 }
  0xb0   :  { %v63_v33 = vrot.slane %v62_v31, 4 }
  0xb1   :  { %v73_v34 = vadd.f32 %v72_v32, %v71_v29 }
  0xb2   :  { %v64_v35 = vadd.f32 %v63_v33, %v62_v31 }
  0xb3   :  { %v74_v36 = vrot.slane %v73_v34, 2 }
  0xb4   :  { %v65_v37 = vrot.slane %v64_v35, 2 }
  0xb5   :  { %v75_v38 = vadd.f32 %v74_v36, %v73_v34 }
  0xb6   :  { %v66_v39 = vadd.f32 %v65_v37, %v64_v35 }
  0xb7   :  { %v76_v40 = vrot.slane %v75_v38, 1 }
  0xb8   :  { %v67_v41 = vrot.slane %v66_v39, 1 }
  0xb9   :  { %v77_v42 = vadd.f32 %v76_v40, %v75_v38 }
  0xba   :  { %v68_v43 = vadd.f32 %v67_v41, %v66_v39 }
  0xbb   :  { %v79_v47 = vmax.f32 %v77_v42, 0.0 }
  0xbc   :  { %v78_v46 = vmax.f32 %v68_v43, 0.0 }
  0xbd   :  { %v85_v52 = vmul.f32 %v81_v44, %v79_v47  ;;  %v84_v53 = vmul.f32 %v80_v45, %v79_v47 }
  0xbe   :  { %v83_v48 = vmul.f32 %v81_v44, %v78_v46  ;;  %v82_v49 = vmul.f32 %v80_v45, %v78_v46 }
  0xbf   :  { %v95_v54 = vsel %vm59_vm0, %v85_v52, 0.0  ;;  %v92_v55 = vsel %vm59_vm0, %v84_v53, 0.0 }
  0xc0   :  { %v89_v50 = vsel %vm59_vm0, %v83_v48, 0.0  ;;  %v86_v51 = vsel %vm59_vm0, %v82_v49, 0.0 }
  0xc1   :  { %90 = vadd.xlane.f32.xlu1 %v89_v50  ;;  %87 = vadd.xlane.f32.xlu0 %v86_v51 }
  0xc5   :  { %96 = vadd.xlane.f32.xlu1 %v95_v54  ;;  %93 = vadd.xlane.f32.xlu0 %v92_v55 }
 0x14e   :  { %v91_v56 = vpop.xlane.xlu1 %90  ;;  %v88_v57 = vpop.xlane.xlu0 %87 }
 0x14f   :  { %v156_v58 = vmul.f32 -1.442695, %v91_v56  ;;  %v155_v59 = vmul.f32 -1.442695, %v88_v57 }
 0x151   :  { %163 = vpow2.f32 %v156_v58 }
 0x152   :  { %165 = vpow2.f32 %v155_v59  ;;  %v97_v60 = vpop.xlane.xlu1 %96  ;;  %v94_v61 = vpop.xlane.xlu0 %93 }
 0x153   :  { %v158_v62 = vmul.f32 -1.442695, %v97_v60  ;;  %v157_v63 = vmul.f32 -1.442695, %v94_v61 }
 0x155   :  { %167 = vpow2.f32 %v158_v62 }
 0x156   :  { %169 = vpow2.f32 %v157_v63 }
 0x15b   :  { %v164_v3 = vpop.eup %163 }
 0x15c   :  { %v166_v7 = vpop.eup %165  ;;  %v111_v10 = vadd.f32 1.0, %v164_v3 }
 0x15d   :  { %v110_v11 = vadd.f32 1.0, %v166_v7 }
 0x15e   :  { %171 = vrcp.f32 %v111_v10 }
 0x15f   :  { %v168_v12 = vpop.eup %167  ;;  %173 = vrcp.f32 %v110_v11 }
 0x160   :  { %v170_v13 = vpop.eup %169  ;;  %v113_v14 = vadd.f32 1.0, %v168_v12 }
 0x161   :  { %v112_v15 = vadd.f32 1.0, %v170_v13 }
 0x162   :  { %175 = vrcp.f32 %v113_v14 }
 0x163   :  { %177 = vrcp.f32 %v112_v15 }
 0x168   :  { %v172_v16 = vpop.eup %171 }
 0x169   :  { %v174_v17 = vpop.eup %173  ;;  %v124_v18 = vmul.f32 %v172_v16, %v282_v8  ;;  %v125_v19 = vmul.f32 %v172_v16, %v284_v9 }
 0x16a   :  { %v122_v20 = vmul.f32 %v174_v17, %v270_v2  ;;  %v123_v21 = vmul.f32 %v174_v17, %v274_v4 }
 0x16b   :  { %132 = vst [vmem:[#allocation5 + $0x10] sm:$0xff] %v124_v18  ;;  %133 = vst [vmem:[#allocation5 + $0x18] sm:$0xff] %v125_v19 }
 0x16c   :  { %v176_v22 = vpop.eup %175  ;;  %130 = vst [vmem:[#allocation5] sm:$0xff] %v122_v20  ;;  %131 = vst [vmem:[#allocation5 + $0x8] sm:$0xff] %v123_v21 }
 0x16d   :  { %v178_v23 = vpop.eup %177  ;;  %v128_v24 = vmul.f32 %v176_v22, %v276_v5  ;;  %v129_v25 = vmul.f32 %v176_v22, %v278_v6 }
 0x16e   :  { %v126_v8 = vmul.f32 %v178_v23, %v266_v0  ;;  %v127_v9 = vmul.f32 %v178_v23, %v268_v1 }
 0x16f   :  { %136 = vst [vmem:[#allocation5 + $0x30] sm:$0xff] %v128_v24  ;;  %137 = vst [vmem:[#allocation5 + $0x38] sm:$0xff] %v129_v25 }
 0x170   :  { %134 = vst [vmem:[#allocation5 + $0x20] sm:$0xff] %v126_v8  ;;  %135 = vst [vmem:[#allocation5 + $0x28] sm:$0xff] %v127_v9 }
 0x171   :  { %212 = shalt.err (!%p209_p12)
}
 0x172   :  { %s213_s9 = scalar_lea.hbm %s336_s3, 1024 }
 0x173   :  { %p214_p13 = scmp.ne.s32.totalorder %s336_s3, %s213_s9  ;;  %p217_p0 = scmp.lt.u32.totalorder %s213_s9, %s336_s3 }
 0x175   :  { %p219_p1 = pnand %p217_p0, %p214_p13 }
 0x177   :  { %222 = shalt.err (!%p219_p1)
}
 0x178   :  { %149 = dma.vmem_to_hbm [thread:$0]  %s144_s5, 1024, %s336_s3, [#allocation4], %s228_s22, %s228_s22, %s229_s23  }
 0x179   :  { %225 = dma.done.wait [#allocation4], 1024  }
 0x17a   :  { %226 = vsyncadd [#allocation4], 4294966272 }
 0x17b   :  { %153 = vsyncpa [#allocation3], 1 }
 0x17c   :  { %154 = vsyncpa [#allocation4], 1 }

</bundles_post_ra>
